<compile_context>
chip_gen: v6e
topology: v6e:2x2x1
jax: 0.10.0
libtpu: 0.0.40
codegen_flags: <defaults>
</compile_context>

<pallas_src>
import functools

import jax
import jax.numpy as jnp
from jax.experimental import pallas as pl
from jax.experimental.pallas import tpu as pltpu

_LANE = 128      # vreg lane width (used only for the VMEM budget estimate)
_SUBLANE = 8     # f32 sublane granule; batch-tile rows are a multiple of this
                 # (would need 16 if the dtype ever becomes bf16)


def _round_up(v, m):
    return ((v + m - 1) // m) * m


def _mlp_kernel(x_ref, w1_ref, b1_ref, w2_ref, b2_ref, o_ref):
    # Fused fc1 -> tanh -> fc2 on one (tm, n_x) batch tile.
    # Feature dims keep their true (tiny) sizes; Mosaic pads the contraction
    # to the sublane granule internally. MXU accumulates in f32 via
    # preferred_element_type. tanh goes to the EUP (separate bundle slot).
    h = jnp.dot(x_ref[...], w1_ref[...], preferred_element_type=jnp.float32)
    h = jnp.tanh(h + b1_ref[...])
    y = jnp.dot(h, w2_ref[...], preferred_element_type=jnp.float32)
    o_ref[...] = (y + b2_ref[...]).astype(o_ref.dtype)


@functools.partial(jax.jit, static_argnames=("block_m",))
def neural_output_forward(x, w1, b1, w2, b2, *, block_m=4096):
    """y = tanh(x @ w1 + b1) @ w2 + b2   (same math as the PyTorch module).

    x : (B, n_x)        float32
    w1: (n_x, hidden)   float32   (== PyTorch fc1.weight.T)
    b1: (hidden,)       float32
    w2: (hidden, n_y)   float32   (== PyTorch fc2.weight.T)
    b2: (n_y,)          float32
    """
    B, n_x = x.shape
    hidden = w1.shape[1]
    n_y = w2.shape[1]

    # Biases as (1, n) rows for 2-D VMEM blocks (free reshape of tiny arrays).
    b1_row = b1.reshape(1, hidden)
    b2_row = b2.reshape(1, n_y)

    # --- batch tiling: big sublane-aligned tiles, >=2 steps when B is large
    #     so the parallel grid axis can shard across both v7x TensorCores ---
    tm = _round_up(min(block_m, B), _SUBLANE)
    bp = _round_up(B, tm)
    if bp // tm < 2 and B >= 2 * _SUBLANE:
        tm = _round_up(-(-B // 2), _SUBLANE)   # ceil(B/2), sublane-aligned
        bp = _round_up(B, tm)

    # Pad batch rows only (no-op HLO when bp == B; tiny otherwise since n_x=4).
    xp = jnp.pad(x, ((0, bp - B), (0, 0)))

    grid = (bp // tm,)

    in_specs = [
        pl.BlockSpec((tm, n_x), lambda i: (i, 0)),       # x: batch-tiled, narrow
        pl.BlockSpec((n_x, hidden), lambda i: (0, 0)),   # w1: resident
        pl.BlockSpec((1, hidden), lambda i: (0, 0)),     # b1: resident
        pl.BlockSpec((hidden, n_y), lambda i: (0, 0)),   # w2: resident
        pl.BlockSpec((1, n_y), lambda i: (0, 0)),        # b2: resident
    ]
    # Narrow output block -> masked vst, but ~42x less HBM writeback than the
    # old lane-padded layout and no full-width post-slice.
    out_spec = pl.BlockSpec((tm, n_y), lambda i: (i, 0))

    # VMEM budget from the lane-padded in-VMEM footprint (Mosaic stores the
    # last dim on 128 lanes): double-buffered x/out tiles + hidden
    # activations + weights, 2x headroom, clamped well under v7x's 64 MiB.
    hp = _round_up(hidden, _LANE)
    elt = jnp.dtype(x.dtype).itemsize
    tile_bytes = elt * (2 * tm * _LANE        # x tile, double-buffered
                        + 2 * tm * _LANE      # out tile, double-buffered
                        + tm * hp             # hidden activations
                        + 4 * hp * _LANE)     # weights/biases (generous)
    vmem_limit = int(min(max(2 * tile_bytes, 16 * 1024 * 1024),
                         48 * 1024 * 1024))

    out = pl.pallas_call(
        _mlp_kernel,
        out_shape=jax.ShapeDtypeStruct((bp, n_y), x.dtype),
        grid=grid,
        in_specs=in_specs,
        out_specs=out_spec,
        compiler_params=pltpu.CompilerParams(
            dimension_semantics=("parallel",),   # megacore split on v7x
            vmem_limit_bytes=vmem_limit,
        ),
    )(xp, w1, b1_row, w2, b2_row)

    return out[:B]   # elided when bp == B; tiny (B, n_y) copy otherwise


def init_params(key, n_x, n_y, hidden_size=16):
    """PyTorch nn.Linear default init: U[-1/sqrt(fan_in), +1/sqrt(fan_in)]."""
    k1, k2, k3, k4 = jax.random.split(key, 4)
    bound1 = 1.0 / float(n_x) ** 0.5
    bound2 = 1.0 / float(hidden_size) ** 0.5
    w1 = jax.random.uniform(k1, (n_x, hidden_size), jnp.float32, -bound1, bound1)
    b1 = jax.random.uniform(k2, (hidden_size,), jnp.float32, -bound1, bound1)
    w2 = jax.random.uniform(k3, (hidden_size, n_y), jnp.float32, -bound2, bound2)
    b2 = jax.random.uniform(k4, (n_y,), jnp.float32, -bound2, bound2)
    return w1, b1, w2, b2


if __name__ == "__main__":
    # NeuralOutput(n_x=4, n_y=3, hidden_size=16) applied to a batch of states.
    n_x, n_y, hidden = 4, 3, 16

    key = jax.random.PRNGKey(0)
    kx, kx2, kp = jax.random.split(key, 3)
    w1, b1, w2, b2 = init_params(kp, n_x, n_y, hidden)

    # Small batch (single grid step).
    x_small = jax.random.normal(kx, (8, n_x), dtype=jnp.float32)
    y_small = jax.block_until_ready(neural_output_forward(x_small, w1, b1, w2, b2))
    ref_small = jnp.tanh(x_small @ w1 + b1) @ w2 + b2
    assert y_small.shape == (8, n_y)
    assert jnp.allclose(y_small, ref_small, atol=1e-5, rtol=1e-5)

    # Larger batch exercising the multi-step grid (>=2 steps for v7x megacore).
    x_big = jax.random.normal(kx2, (1024, n_x), dtype=jnp.float32)
    y_big = jax.block_until_ready(neural_output_forward(x_big, w1, b1, w2, b2))
    ref_big = jnp.tanh(x_big @ w1 + b1) @ w2 + b2
    assert y_big.shape == (1024, n_y)
    assert jnp.allclose(y_big, ref_big, atol=1e-5, rtol=1e-5)

    print("KERNEL_OK")
</pallas_src>

<mosaic_0001>
module attributes {stable_mosaic.version = 11 : i64} {
  func.func @_mlp_kernel(%arg0: i32, %arg1: memref<8x4xf32, #tpu.memory_space<vmem>>, %arg2: memref<4x16xf32, #tpu.memory_space<vmem>>, %arg3: memref<1x16xf32, #tpu.memory_space<vmem>>, %arg4: memref<16x3xf32, #tpu.memory_space<vmem>>, %arg5: memref<1x3xf32, #tpu.memory_space<vmem>>, %arg6: memref<8x3xf32, #tpu.memory_space<vmem>>) attributes {dimension_semantics = [#tpu.dimension_semantics<parallel>], iteration_bounds = array<i64: 1>, scalar_prefetch = 0 : i64, scratch_operands = 0 : i64, tpu.core_type = #tpu.core_type<tc>, window_params = [{transform_indices = @transform_0, window_bounds = array<i64: 8, 4>}, {pipeline_mode = #tpu.pipeline_mode<synchronous>, transform_indices = @transform_1, window_bounds = array<i64: 4, 16>}, {pipeline_mode = #tpu.pipeline_mode<synchronous>, transform_indices = @transform_2, window_bounds = array<i64: 1, 16>}, {pipeline_mode = #tpu.pipeline_mode<synchronous>, transform_indices = @transform_3, window_bounds = array<i64: 16, 3>}, {pipeline_mode = #tpu.pipeline_mode<synchronous>, transform_indices = @transform_4, window_bounds = array<i64: 1, 3>}, {transform_indices = @transform_5, window_bounds = array<i64: 8, 3>}]} {
    %c0 = arith.constant 0 : index
    %c0_0 = arith.constant 0 : index
    %0 = vector.load %arg1[%c0, %c0_0] : memref<8x4xf32, #tpu.memory_space<vmem>>, vector<8x4xf32>
    %c0_1 = arith.constant 0 : index
    %c0_2 = arith.constant 0 : index
    %1 = vector.load %arg2[%c0_1, %c0_2] : memref<4x16xf32, #tpu.memory_space<vmem>>, vector<4x16xf32>
    %cst = arith.constant dense<0.000000e+00> : vector<8x16xf32>
    %2 = tpu.matmul %0, %1, %cst {dimension_numbers = #tpu.dot_dimension_numbers<[1], [0], [0], [1], [0, 0, 1, 1], [], []>} : vector<8x4xf32>, vector<4x16xf32>, vector<8x16xf32> -> vector<8x16xf32>
    %c0_3 = arith.constant 0 : index
    %c0_4 = arith.constant 0 : index
    %3 = vector.load %arg3[%c0_3, %c0_4] : memref<1x16xf32, #tpu.memory_space<vmem>>, vector<1x16xf32>
    %4 = vector.broadcast %3 : vector<1x16xf32> to vector<8x16xf32>
    %5 = arith.addf %2, %4 : vector<8x16xf32>
    %6 = math.tanh %5 : vector<8x16xf32>
    %c0_5 = arith.constant 0 : index
    %c0_6 = arith.constant 0 : index
    %7 = vector.load %arg4[%c0_5, %c0_6] : memref<16x3xf32, #tpu.memory_space<vmem>>, vector<16x3xf32>
    %cst_7 = arith.constant dense<0.000000e+00> : vector<8x3xf32>
    %8 = tpu.matmul %6, %7, %cst_7 {dimension_numbers = #tpu.dot_dimension_numbers<[1], [0], [0], [1], [0, 0, 1, 1], [], []>} : vector<8x16xf32>, vector<16x3xf32>, vector<8x3xf32> -> vector<8x3xf32>
    %c0_8 = arith.constant 0 : index
    %c0_9 = arith.constant 0 : index
    %9 = vector.load %arg5[%c0_8, %c0_9] : memref<1x3xf32, #tpu.memory_space<vmem>>, vector<1x3xf32>
    %10 = vector.broadcast %9 : vector<1x3xf32> to vector<8x3xf32>
    %11 = arith.addf %8, %10 : vector<8x3xf32>
    %c0_10 = arith.constant 0 : index
    %c0_11 = arith.constant 0 : index
    %12 = vector.load %arg6[%c0_10, %c0_11] : memref<8x3xf32, #tpu.memory_space<vmem>>, vector<8x3xf32>
    tpu.vector_store %arg6[%c0_10, %c0_11], %11 {strides = array<i32>} : memref<8x3xf32, #tpu.memory_space<vmem>>, vector<8x3xf32>,
    return
  }
  func.func @transform_0(%arg0: i32) -> (i32, i32) {
    %c0_i32 = arith.constant 0 : i32
    %c0_i32_0 = arith.constant 0 : i32
    return %arg0, %c0_i32 : i32, i32
  }
  func.func @transform_1(%arg0: i32) -> (i32, i32) {
    %c0_i32 = arith.constant 0 : i32
    %c0_i32_0 = arith.constant 0 : i32
    %c0_i32_1 = arith.constant 0 : i32
    return %c0_i32, %c0_i32_0 : i32, i32
  }
  func.func @transform_2(%arg0: i32) -> (i32, i32) {
    %c0_i32 = arith.constant 0 : i32
    %c0_i32_0 = arith.constant 0 : i32
    %c0_i32_1 = arith.constant 0 : i32
    return %c0_i32, %c0_i32_0 : i32, i32
  }
  func.func @transform_3(%arg0: i32) -> (i32, i32) {
    %c0_i32 = arith.constant 0 : i32
    %c0_i32_0 = arith.constant 0 : i32
    %c0_i32_1 = arith.constant 0 : i32
    return %c0_i32, %c0_i32_0 : i32, i32
  }
  func.func @transform_4(%arg0: i32) -> (i32, i32) {
    %c0_i32 = arith.constant 0 : i32
    %c0_i32_0 = arith.constant 0 : i32
    %c0_i32_1 = arith.constant 0 : i32
    return %c0_i32, %c0_i32_0 : i32, i32
  }
  func.func @transform_5(%arg0: i32) -> (i32, i32) {
    %c0_i32 = arith.constant 0 : i32
    %c0_i32_0 = arith.constant 0 : i32
    return %arg0, %c0_i32 : i32, i32
  }
}

</mosaic_0001>

<bundles_post_ra>
// kernel: neural_output_forward.1
= control target key start
LH: loop header
LB: loop body
LE: loop exit
PB: predicated region body
PF: predicated region fallthrough
CT: control target
= control target key end

     0   :  { %vm33_vm0 = vcmask 1043456   ;;  %vm29_vm1 = vcmask 31744   ;;  %v223_v0 = vmov 0.0   ;;  %vm224_vm2 = vmmov 0   ;;  %s276_s1 = inlined_call_operand.vmem [shape: f32[4,16], index: 1, kind: input, shape index: {}]   ;;  %s277_s0 = inlined_call_operand.vmem [shape: f32[8,4], index: 0, kind: input, shape index: {}]   ;;  %s278_s3 = inlined_call_operand.vmem [shape: f32[16,3], index: 3, kind: input, shape index: {}]   ;;  %s279_s2 = inlined_call_operand.vmem [shape: f32[1,16], index: 2, kind: input, shape index: {}]   ;;  %s280_s4 = inlined_call_operand.vmem [shape: f32[1,3], index: 4, kind: input, shape index: {}]   ;;  %s281_s5 = inlined_call_operand.vmem [shape: f32[8,3], index: 5, kind: output, shape index: {}]  }
   0x1   :  { %207 = vmatprep.subr.mxu0 %v223_v0  ;;  %v21_v1 = vld [vmem:[%s276_s1] sm:$0xf]  ;;  %209 = vmatprep.mubr.msk.f32.mxu0 %vm224_vm2, %v223_v0  ;;  %v109_v3 = vld [vmem:[%s278_s3 + $0x8] sm:$0xff]  ;;  %vm117_vm3 = vcmask 130048   ;;  %vm191_vm4 = vcmask 23552  }
   0x2   :  { %v20_v2 = vld [vmem:[%s277_s0] sm:$0xff]  ;;  %208 = vmatpush3.msk.msra.mxu0 %vm33_vm0, %v21_v1  ;;  %212 = vmatprep.subr.mxu1 %v223_v0 }
   0x3   :  { %210 = vmatmul.mubr.msk.f32.vlgmr.msra.gmra.mxu0 %vm29_vm1, %v20_v2  ;;  %216 = vmatprep.mubr.msk.f32.mxu1 %vm224_vm2, %v223_v0  ;;  %v108_v4 = vld [vmem:[%s278_s3] sm:$0xff] }
   0x4   :  { %213 = vmatpush3.msra.mxu1 %v109_v3  ;;  %v197_v5 = vld [vmem:[%s279_s2] ss:$0 sm:$0xff] }
   0x5   :  { %214 = vmatprep.subr.mxu1 %v223_v0  ;;  %v200_v10 = vld [vmem:[%s280_s4] ss:$0 sm:$0xff] }
   0x6   :  { %215 = vmatpush3.msra.mxu1 %v108_v4 }
  0xc3   :  { %v103_v6 = vpop.f32.mrf.mxu0 }
  0xc4   :  { %v104_v7 = vadd.f32 %v197_v5, %v103_v6 }
  0xc5   :  { %v211_v8 = vpop.f32.mrf.mxu0 }
  0xc6   :  { %221 = vtanh.f32 %v104_v7 }
  0xd3   :  { %v222_v9 = vpop.eup %221 }
  0xd4   :  { %217 = vmatmul.mubr.msk.f32.vlgmr.msra.gmra.mxu1 %vm117_vm3, %v222_v9 }
 0x194   :  { %v187_v11 = vpop.f32.mrf.mxu1 }
 0x195   :  { %v188_v12 = vadd.f32 %v200_v10, %v187_v11 }
 0x196   :  { %v218_v13 = vpop.f32.mrf.mxu1 }
 0x197   :  { %192 = vst.msk [vmem:[%s281_s5] sm:$0xff] %vm191_vm4, %v188_v12 }

</bundles_post_ra>
